<compile_context>
chip_gen: v7x
topology: tpu7x:2x2x1
jax: 0.10.0
libtpu: 0.0.40
codegen_flags: <defaults>
</compile_context>

<pallas_src>
import math
import functools

import numpy as np
import jax
import jax.numpy as jnp
from jax.experimental import pallas as pl
from jax.experimental.pallas import tpu as pltpu

EPS = 1e-5
BN_SCALE = float(1.0 / np.sqrt(1.0 + EPS))  # gamma / sqrt(running_var + eps)
LANE = 128
ACT_DTYPE = jnp.bfloat16


def _round_up(v, m):
    return ((v + m - 1) // m) * m


def pad_lane(c):
    return _round_up(c, LANE)


def _cparams(semantics, vmem_est=None):
    """CompilerParams; only raise the scoped-VMEM limit when the estimate
    actually needs it, and never above 48 MiB (v7x has 64 MiB physical)."""
    kwargs = dict(dimension_semantics=semantics)
    if vmem_est is not None:
        need = int(vmem_est) * 2 + (4 << 20)
        if need > (28 << 20):
            kwargs["vmem_limit_bytes"] = int(min(max(need, 32 << 20), 48 << 20))
    return pltpu.CompilerParams(**kwargs)


# ------------------------------------------------------------------ kernels

def _mm_kernel(x_ref, w_ref, b_ref, o_ref, *, relu6):
    # (bm, Cin) @ (Cin, bn) on the MXU, f32 accumulate, bias (+ReLU6) epilogue.
    y = jnp.dot(x_ref[...], w_ref[...], preferred_element_type=jnp.float32)
    y = y + b_ref[...]
    if relu6:
        y = jnp.clip(y, 0.0, 6.0)
    o_ref[...] = y.astype(o_ref.dtype)


def _make_fused_invres_kernel(expand, use_res, H, W, aligned):
    """Fused stride-1 inverted residual: expand 1x1 -> dw3x3 -> project 1x1
    (+residual).  Hidden activation stays in a VMEM scratch with an in-kernel
    zero halo.  `aligned` selects the layout-trivial reshape path (W % 8 == 0)
    or a per-row scratch copy path for tiny spatial maps."""

    def kernel(*refs):
        if expand:
            x_ref, we_ref, be_ref, wd_ref, bd_ref, wp_ref, bp_ref, o_ref = refs[:8]
            scratch = refs[8:]
        else:
            x_ref, wd_ref, bd_ref, wp_ref, bp_ref, o_ref = refs[:6]
            scratch = refs[6:]
        hid_ref = scratch[0]
        Ch = hid_ref.shape[-1]

        x2 = x_ref[0]                                   # (H*W, Cin) bf16
        # zero the padded hidden scratch (keeps the 1-pixel halo at zero)
        hid_ref[...] = jnp.zeros_like(hid_ref)

        # ---- expand 1x1 + ReLU6 (skipped for t == 1 blocks) ----
        if expand:
            h2 = jnp.dot(x2, we_ref[...], preferred_element_type=jnp.float32)
            h2 = jnp.clip(h2 + be_ref[...], 0.0, 6.0).astype(hid_ref.dtype)
        else:
            h2 = x2                                     # Cin == Ch

        if aligned:
            hid_ref[1:H + 1, 1:W + 1, :] = h2.reshape(H, W, Ch)
        else:
            for r in range(H):
                hid_ref[r + 1, 1:W + 1, :] = h2[r * W:(r + 1) * W, :]

        # ---- depthwise 3x3 (stride 1, pad 1) + ReLU6 ----
        hp = hid_ref[...]                               # (H+2, W+2, Ch)
        wd = wd_ref[...].astype(jnp.float32)
        acc = jnp.zeros((H, W, Ch), jnp.float32)
        for kh in range(3):
            for kw in range(3):
                tap = hp[kh:kh + H, kw:kw + W, :].astype(jnp.float32)
                acc = acc + tap * wd[kh, kw].reshape(1, 1, Ch)
        d = jnp.clip(acc + bd_ref[...], 0.0, 6.0).astype(ACT_DTYPE)

        if aligned:
            d2 = d.reshape(H * W, Ch)
        else:
            flat_ref = scratch[1]
            for r in range(H):
                flat_ref[r * W:(r + 1) * W, :] = d[r]
            d2 = flat_ref[...]

        # ---- project 1x1 (+ fused residual) ----
        y = jnp.dot(d2, wp_ref[...], preferred_element_type=jnp.float32)
        y = y + bp_ref[...]
        if use_res:
            y = y + x2.astype(jnp.float32)
        o_ref[0] = y.astype(o_ref.dtype)

    return kernel


def _dw_s2_kernel(ph_ref, w_ref, b_ref, o_ref):
    # ph block: (4, Ho+1, Wo+1, BC) = four spatial phases of the padded input
    # for one batch element / channel slice.  Every stride-2 tap is a
    # contiguous slice of one phase -> only the strided outputs are computed.
    ph = ph_ref[...]
    w = w_ref[...].astype(jnp.float32)
    _, Ho, Wo, BC = o_ref.shape
    acc = jnp.zeros((1, Ho, Wo, BC), jnp.float32)
    for kh in range(3):
        for kw in range(3):
            p = (kh % 2) * 2 + (kw % 2)
            ro, co = kh // 2, kw // 2
            sl = ph[p:p + 1, ro:ro + Ho, co:co + Wo, :]
            acc = acc + sl.astype(jnp.float32) * w[kh, kw].reshape(1, 1, 1, BC)
    y = acc + b_ref[...]
    o_ref[...] = jnp.clip(y, 0.0, 6.0).astype(o_ref.dtype)


def _pooled_linear_kernel(x_ref, w_ref, b_ref, o_ref):
    xm = jnp.mean(x_ref[...].astype(jnp.float32), axis=1)        # (1, C)
    y = jnp.dot(xm.astype(ACT_DTYPE), w_ref[...],
                preferred_element_type=jnp.float32) + b_ref[...]
    o_ref[...] = y.reshape(o_ref.shape)


# ----------------------------------------------------------------- wrappers

def _pick_tiling(M):
    """Return (bm, Mp): 8-aligned row tile and padded row count, preferring
    >= 2 aligned grid blocks so pipelining / megacore splitting can happen."""
    M8 = _round_up(M, 8)
    for bm in (1024, 512, 256):
        if M8 % bm == 0 and M8 // bm >= 2:
            return bm, M8
    if M8 > 256:
        return 256, _round_up(M8, 256)
    return M8, M8


def pw_matmul(x, w, bias, relu6):
    """Fused (M,Cin)@(Cin,Cout) matmul + bias (+ReLU6), BN scale pre-folded."""
    M, Cin = x.shape
    Cout = w.shape[1]
    bm, Mp = _pick_tiling(M)
    if Mp != M:
        x = jnp.pad(x, ((0, Mp - M), (0, 0)))
    m_blocks = Mp // bm
    # small-M tail layers: split Cout so the grid has >= 2 points (v7x megacore)
    if m_blocks == 1 and Cout >= 256 and (Cout // 2) % LANE == 0:
        bn = Cout // 2
    else:
        bn = Cout
    grid = (m_blocks, Cout // bn)
    b2 = bias.reshape(1, Cout).astype(jnp.float32)
    est = (bm * Cin + Cin * bn + bm * bn) * 2 + bm * bn * 4
    y = pl.pallas_call(
        functools.partial(_mm_kernel, relu6=relu6),
        out_shape=jax.ShapeDtypeStruct((Mp, Cout), ACT_DTYPE),
        grid=grid,
        in_specs=[
            pl.BlockSpec((bm, Cin), lambda i, j: (i, 0)),
            pl.BlockSpec((Cin, bn), lambda i, j: (0, j)),
            pl.BlockSpec((1, bn), lambda i, j: (0, j)),
        ],
        out_specs=pl.BlockSpec((bm, bn), lambda i, j: (i, j)),
        compiler_params=_cparams(("parallel", "parallel"), est),
    )(x, w, b2)
    return y if Mp == M else y[:M]


def pointwise_conv(x, w, bias, relu6):
    N, H, W, Cin = x.shape
    y = pw_matmul(x.reshape(N * H * W, Cin), w, bias, relu6)
    return y.reshape(N, H, W, -1)


def conv3x3_bn_relu6(x, w_mat, bias, stride):
    """Standard 3x3 conv (pad=1) via im2col + Pallas matmul (stem only)."""
    N, H, W, Cin = x.shape
    Ho, Wo = H // stride, W // stride
    xp = jnp.pad(x, ((0, 0), (1, 1), (1, 1), (0, 0)))
    cols = []
    for kh in range(3):
        for kw in range(3):
            cols.append(xp[:, kh:kh + stride * (Ho - 1) + 1:stride,
                           kw:kw + stride * (Wo - 1) + 1:stride, :])
    patches = jnp.concatenate(cols, axis=-1).reshape(N * Ho * Wo, 9 * Cin)
    k_pad = w_mat.shape[0]                        # contraction padded to 128
    patches = jnp.pad(patches, ((0, 0), (0, k_pad - 9 * Cin)))
    y = pw_matmul(patches.astype(ACT_DTYPE), w_mat, bias, relu6=True)
    return y.reshape(N, Ho, Wo, -1)


def fused_inverted_residual(x, blk):
    """One pallas_call per stride-1 inverted residual block, grid over batch."""
    N, H, W, Cin = x.shape
    expand = (blk['expand'] != 1)
    use_res = blk['use_res']
    wd = blk['dw_w']
    Ch = wd.shape[-1]
    wp = blk['proj_w']
    Cout = wp.shape[-1]
    bd = blk['dw_b'].reshape(1, 1, Ch).astype(jnp.float32)
    bp = blk['proj_b'].reshape(1, Cout).astype(jnp.float32)
    aligned = (W % 8 == 0)
    HW = H * W

    xf = x.reshape(N, HW, Cin)
    in_specs = [pl.BlockSpec((1, HW, Cin), lambda n: (n, 0, 0))]
    args = [xf]
    if expand:
        we = blk['pw_w']
        be = blk['pw_b'].reshape(1, Ch).astype(jnp.float32)
        in_specs += [pl.BlockSpec((Cin, Ch), lambda n: (0, 0)),
                     pl.BlockSpec((1, Ch), lambda n: (0, 0))]
        args += [we, be]
    in_specs += [pl.BlockSpec((3, 3, Ch), lambda n: (0, 0, 0)),
                 pl.BlockSpec((1, 1, Ch), lambda n: (0, 0, 0)),
                 pl.BlockSpec((Ch, Cout), lambda n: (0, 0)),
                 pl.BlockSpec((1, Cout), lambda n: (0, 0))]
    args += [wd, bd, wp, bp]

    scratch = [pltpu.VMEM((H + 2, W + 2, Ch), ACT_DTYPE)]
    if not aligned:
        scratch.append(pltpu.VMEM((HW, Ch), ACT_DTYPE))

    est = (2 * HW * Cin * 2 + 2 * HW * Cout * 2 + (H + 2) * (W + 2) * Ch * 2
           + 2 * HW * Ch * 4 + (Cin * Ch + Ch * Cout + 9 * Ch) * 2)

    out = pl.pallas_call(
        _make_fused_invres_kernel(expand, use_res, H, W, aligned),
        out_shape=jax.ShapeDtypeStruct((N, HW, Cout), ACT_DTYPE),
        grid=(N,),
        in_specs=in_specs,
        out_specs=pl.BlockSpec((1, HW, Cout), lambda n: (n, 0, 0)),
        scratch_shapes=scratch,
        compiler_params=_cparams(("parallel",), est),
    )(*args)
    return out.reshape(N, H, W, Cout)


def _pick_dw_channel_block(C, Hh, Wh):
    for bc in (1024, 768, 640, 512, 384, 256, 128):
        if bc <= C and C % bc == 0 and 4 * Hh * Wh * bc * 2 <= (6 << 20):
            return bc
    return min(C, LANE)


def depthwise_s2(x, w, bias):
    """Stride-2 depthwise 3x3 + BN + ReLU6 (unfused path, only the strided
    output positions are computed via the 4-phase decomposition)."""
    N, H, W, C = x.shape
    Ho, Wo = H // 2, W // 2
    Hh, Wh = Ho + 1, Wo + 1
    xp = jnp.pad(x, ((0, 0), (1, 1), (1, 1), (0, 0)))
    ph = jnp.stack([xp[:, 0::2, 0::2, :], xp[:, 0::2, 1::2, :],
                    xp[:, 1::2, 0::2, :], xp[:, 1::2, 1::2, :]], axis=1)
    ph = ph.reshape(N * 4, Hh, Wh, C)
    bc = _pick_dw_channel_block(C, Hh, Wh)
    nc = C // bc
    b4 = bias.reshape(1, 1, 1, C).astype(jnp.float32)
    est = 4 * Hh * Wh * bc * 2 + Ho * Wo * bc * (4 + 2)
    return pl.pallas_call(
        _dw_s2_kernel,
        out_shape=jax.ShapeDtypeStruct((N, Ho, Wo, C), ACT_DTYPE),
        grid=(N, nc),
        in_specs=[pl.BlockSpec((4, Hh, Wh, bc), lambda n, c: (n, 0, 0, c)),
                  pl.BlockSpec((3, 3, bc), lambda n, c: (0, 0, c)),
                  pl.BlockSpec((1, 1, 1, bc), lambda n, c: (0, 0, 0, c))],
        out_specs=pl.BlockSpec((1, Ho, Wo, bc), lambda n, c: (n, 0, 0, c)),
        compiler_params=_cparams(("parallel", "parallel"), est),
    )(ph, w, b4)


def pooled_linear(x, w, b):
    """Global average pool over HW + classifier, fused; classes padded to 128."""
    N, HW, C = x.shape
    Kp = w.shape[1]
    y = pl.pallas_call(
        _pooled_linear_kernel,
        out_shape=jax.ShapeDtypeStruct((N, 1, Kp), jnp.float32),
        grid=(N,),
        in_specs=[
            pl.BlockSpec((1, HW, C), lambda n: (n, 0, 0)),
            pl.BlockSpec((C, Kp), lambda n: (0, 0)),
            pl.BlockSpec((1, Kp), lambda n: (0, 0)),
        ],
        out_specs=pl.BlockSpec((1, 1, Kp), lambda n: (n, 0, 0)),
        compiler_params=_cparams(("parallel",)),
    )(x, w, b.reshape(1, Kp).astype(jnp.float32))
    return y.reshape(N, Kp)


# ----------------------------------------------------------------- params

def make_divisible(x, divisible_by=8):
    return int(np.ceil(x * 1.0 / divisible_by) * divisible_by)


def _conv3x3_w(key, cin, cout, cout_p):
    # BN scale folded in (eval-mode identity stats -> uniform scalar).
    std = math.sqrt(2.0 / (9 * cout))
    w = jax.random.normal(key, (3, 3, cin, cout), jnp.float32) * std * BN_SCALE
    w = w.reshape(9 * cin, cout)                  # (kh, kw, cin) im2col order
    kin_p = pad_lane(9 * cin)
    w = jnp.pad(w, ((0, kin_p - 9 * cin), (0, cout_p - cout)))
    return w.astype(ACT_DTYPE)


def _conv1x1_w(key, cin, cout, cin_p, cout_p):
    std = math.sqrt(2.0 / cout)
    w = jax.random.normal(key, (cin, cout), jnp.float32) * std * BN_SCALE
    w = jnp.pad(w, ((0, cin_p - cin), (0, cout_p - cout)))
    return w.astype(ACT_DTYPE)


def _dwconv3x3_w(key, c, c_p):
    std = math.sqrt(2.0 / (9 * c))
    w = jax.random.normal(key, (3, 3, c), jnp.float32) * std * BN_SCALE
    w = jnp.pad(w, ((0, 0), (0, 0), (0, c_p - c)))
    return w.astype(ACT_DTYPE)


def build_mobilenet_v2_params(key, n_class=1000, width_mult=1.0):
    settings = [[1, 16, 1, 1], [6, 24, 2, 2], [6, 32, 3, 2], [6, 64, 4, 2],
                [6, 96, 3, 1], [6, 160, 3, 2], [6, 320, 1, 1]]
    input_channel = 32
    last_channel = make_divisible(1280 * width_mult) if width_mult > 1.0 else 1280
    keys = iter(jax.random.split(key, 96))

    features = []
    features.append(dict(
        type='stem',
        w=_conv3x3_w(next(keys), 3, input_channel, pad_lane(input_channel)),
        bias=jnp.zeros((pad_lane(input_channel),), jnp.float32)))

    for t, c, n, st in settings:
        output_channel = make_divisible(c * width_mult) if t > 1 else c
        for i in range(n):
            stride = st if i == 0 else 1
            hidden = int(input_channel * t)
            in_p, hid_p = pad_lane(input_channel), pad_lane(hidden)
            out_p = pad_lane(output_channel)
            blk = dict(type='invres_s1' if stride == 1 else 'invres_s2',
                       expand=t,
                       use_res=(stride == 1 and input_channel == output_channel))
            if t != 1:
                blk['pw_w'] = _conv1x1_w(next(keys), input_channel, hidden, in_p, hid_p)
                blk['pw_b'] = jnp.zeros((hid_p,), jnp.float32)
            blk['dw_w'] = _dwconv3x3_w(next(keys), hidden, hid_p)
            blk['dw_b'] = jnp.zeros((hid_p,), jnp.float32)
            blk['proj_w'] = _conv1x1_w(next(keys), hidden, output_channel, hid_p, out_p)
            blk['proj_b'] = jnp.zeros((out_p,), jnp.float32)
            features.append(blk)
            input_channel = output_channel

    in_p, lc_p = pad_lane(input_channel), pad_lane(last_channel)
    features.append(dict(
        type='conv1x1bn',
        w=_conv1x1_w(next(keys), input_channel, last_channel, in_p, lc_p),
        bias=jnp.zeros((lc_p,), jnp.float32)))

    kp = pad_lane(n_class)
    cls_w = jax.random.normal(next(keys), (last_channel, n_class), jnp.float32) * 0.01
    cls_w = jnp.pad(cls_w, ((0, lc_p - last_channel), (0, kp - n_class))).astype(ACT_DTYPE)
    cls_b = jnp.zeros((kp,), jnp.float32)
    return features, (cls_w, cls_b, n_class)


# ----------------------------------------------------------------- forward

def mobilenet_v2_forward(x_nchw, features, classifier):
    x = jnp.transpose(x_nchw, (0, 2, 3, 1)).astype(ACT_DTYPE)   # NCHW -> NHWC
    for f in features:
        kind = f['type']
        if kind == 'stem':
            x = conv3x3_bn_relu6(x, f['w'], f['bias'], stride=2)
        elif kind == 'conv1x1bn':
            x = pointwise_conv(x, f['w'], f['bias'], relu6=True)
        elif kind == 'invres_s1':
            x = fused_inverted_residual(x, f)
        else:  # 'invres_s2': stride-2 inverted residual (never has residual)
            y = x
            if f['expand'] != 1:
                y = pointwise_conv(y, f['pw_w'], f['pw_b'], relu6=True)
            y = depthwise_s2(y, f['dw_w'], f['dw_b'])
            x = pointwise_conv(y, f['proj_w'], f['proj_b'], relu6=False)
    N, H, W, C = x.shape
    cls_w, cls_b, n_class = classifier
    logits = pooled_linear(x.reshape(N, H * W, C), cls_w, cls_b)
    return logits[:, :n_class]


# ----------------------------------------------------------------- main

if __name__ == "__main__":
    key = jax.random.PRNGKey(0)
    pkey, xkey = jax.random.split(key)

    n_class = 10                      # small head; architecture channels are fixed
    features, classifier = build_mobilenet_v2_params(pkey, n_class=n_class)

    # smallest valid input: input_size % 32 == 0 -> 32x32, batch=2, NCHW like PyTorch
    x = jax.random.normal(xkey, (2, 3, 32, 32), jnp.float32)

    logits = mobilenet_v2_forward(x, features, classifier)
    logits = jax.block_until_ready(logits)
    assert logits.shape == (2, n_class)
    assert bool(jnp.all(jnp.isfinite(logits)))
    print("KERNEL_OK")
</pallas_src>

<mosaic_0001>
module attributes {stable_mosaic.version = 11 : i64} {
  func.func @_mm_kernel(%arg0: i32, %arg1: i32, %arg2: memref<256x128xbf16, #tpu.memory_space<vmem>>, %arg3: memref<128x128xbf16, #tpu.memory_space<vmem>>, %arg4: memref<1x128xf32, #tpu.memory_space<vmem>>, %arg5: memref<256x128xbf16, #tpu.memory_space<vmem>>) attributes {dimension_semantics = [#tpu.dimension_semantics<parallel>, #tpu.dimension_semantics<parallel>], iteration_bounds = array<i64: 2, 1>, scalar_prefetch = 0 : i64, scratch_operands = 0 : i64, tpu.core_type = #tpu.core_type<tc>, window_params = [{transform_indices = @transform_0, window_bounds = array<i64: 256, 128>}, {transform_indices = @transform_1, window_bounds = array<i64: 128, 128>}, {transform_indices = @transform_2, window_bounds = array<i64: 1, 128>}, {transform_indices = @transform_3, window_bounds = array<i64: 256, 128>}]} {
    %c0 = arith.constant 0 : index
    %c0_0 = arith.constant 0 : index
    %0 = vector.load %arg2[%c0, %c0_0] : memref<256x128xbf16, #tpu.memory_space<vmem>>, vector<256x128xbf16>
    %c0_1 = arith.constant 0 : index
    %c0_2 = arith.constant 0 : index
    %1 = vector.load %arg3[%c0_1, %c0_2] : memref<128x128xbf16, #tpu.memory_space<vmem>>, vector<128x128xbf16>
    %cst = arith.constant dense<0.000000e+00> : vector<256x128xf32>
    %2 = tpu.matmul %0, %1, %cst {dimension_numbers = #tpu.dot_dimension_numbers<[1], [0], [0], [1], [0, 0, 1, 1], [], []>} : vector<256x128xbf16>, vector<128x128xbf16>, vector<256x128xf32> -> vector<256x128xf32>
    %c0_3 = arith.constant 0 : index
    %c0_4 = arith.constant 0 : index
    %3 = vector.load %arg4[%c0_3, %c0_4] : memref<1x128xf32, #tpu.memory_space<vmem>>, vector<1x128xf32>
    %4 = vector.broadcast %3 : vector<1x128xf32> to vector<256x128xf32>
    %5 = arith.addf %2, %4 : vector<256x128xf32>
    %cst_5 = arith.constant 0.000000e+00 : f32
    %cst_6 = arith.constant 6.000000e+00 : f32
    %6 = vector.broadcast %cst_5 : f32 to vector<256x128xf32>
    %7 = arith.maximumf %6, %5 : vector<256x128xf32>
    %8 = vector.broadcast %cst_6 : f32 to vector<256x128xf32>
    %9 = arith.minimumf %8, %7 : vector<256x128xf32>
    %10 = arith.truncf %9 : vector<256x128xf32> to vector<256x128xbf16>
    %c0_7 = arith.constant 0 : index
    %c0_8 = arith.constant 0 : index
    %11 = vector.load %arg5[%c0_7, %c0_8] : memref<256x128xbf16, #tpu.memory_space<vmem>>, vector<256x128xbf16>
    tpu.vector_store %arg5[%c0_7, %c0_8], %10 {strides = array<i32>} : memref<256x128xbf16, #tpu.memory_space<vmem>>, vector<256x128xbf16>,
    return
  }
  func.func @transform_0(%arg0: i32, %arg1: i32) -> (i32, i32) {
    %c0_i32 = arith.constant 0 : i32
    %c0_i32_0 = arith.constant 0 : i32
    return %arg0, %c0_i32 : i32, i32
  }
  func.func @transform_1(%arg0: i32, %arg1: i32) -> (i32, i32) {
    %c0_i32 = arith.constant 0 : i32
    %c0_i32_0 = arith.constant 0 : i32
    return %c0_i32, %arg1 : i32, i32
  }
  func.func @transform_2(%arg0: i32, %arg1: i32) -> (i32, i32) {
    %c0_i32 = arith.constant 0 : i32
    %c0_i32_0 = arith.constant 0 : i32
    return %c0_i32, %arg1 : i32, i32
  }
  func.func @transform_3(%arg0: i32, %arg1: i32) -> (i32, i32) {
    %c0_i32 = arith.constant 0 : i32
    return %arg0, %arg1 : i32, i32
  }
}

</mosaic_0001>

<bundles_post_ra>
// kernel: tpu_custom_call.1
= control target key start
LH: loop header
LB: loop body
LE: loop exit
PB: predicated region body
PF: predicated region fallthrough
CT: control target
= control target key end

     0   :  { %8 = vsyncpa [#allocation3], 0  ;;  %s1817_s0 = inlined_call_operand.hbm [shape: bf16[512,128], index: 0, kind: input, shape index: {}]   ;;  %s1818_s1 = inlined_call_operand.hbm [shape: bf16[128,128], index: 1, kind: input, shape index: {}]   ;;  %s1819_s2 = inlined_call_operand.vmem [shape: f32[1,128], index: 2, kind: input, shape index: {}]   ;;  %s1820_s3 = inlined_call_operand.hbm [shape: bf16[512,128], index: 3, kind: output, shape index: {}]  }
   0x1   :  { %10 = vsyncpa [#allocation3 + $0x1], 0 }
   0x2   :  { %11 = vsyncpa [#allocation6], 0 }
   0x3   :  { %12 = vsyncpa [#allocation4], 0 }
   0x4   :  { %14 = vsyncpa [#allocation4 + $0x1], 0  ;;  %s1514_s12 = smov 0   ;;  %s1516_s13 = smov 0  }
   0x5   :  { %s1518_s14 = smov 0   ;;  %s1520_s15 = smov 0  }
   0x6   :  { %s1522_s16 = smov 0   ;;  %s1524_s17 = smov 0  }
   0x7 LB: > { %s948_s18 = sadd.s32 4294967295, %s1485_s17   ;;  %s949_s19 = sadd.s32 4294967294, %s1485_s17   ;;  %s1485_s17 = sphi %s1524_s17, %s20_s17   ;;  %s1481_s16 = sphi %s1522_s16, %s1844_s16   ;;  %s1477_s15 = sphi %s1520_s15, %s1843_s15   ;;  %s1473_s14 = sphi %s1518_s14, %s1842_s14   ;;  %s1469_s13 = sphi %s1516_s13, %s1841_s13   ;;  %s1465_s12 = sphi %s1514_s12, %s1840_s12  }
   0x8   : > { %p52_p0 = scmp.ne.s32.totalorder %s1469_s13, %s1465_s12  ;;  %p1548_p1 = scmp.eq.s32.totalorder %s948_s18, 0 }
   0x9   : > { %p1552_p2 = scmp.eq.s32.totalorder %s948_s18, 1  ;;  %p136_p3 = scmp.eq.s32.totalorder %s949_s19, 1 }
   0xa   : > { %s1825_s20 = scalar_select %p1548_p1, 1, 0 }
   0xb   : > { %s1826_s21 = scalar_select %p1552_p2, 1, 0 }
   0xc   : > { %p1558_p4 = por %p1548_p1, %p52_p0  ;;  %p950_p5 = scmp.ge.s32.totalorder %s1485_s17, 1 }
   0xd   : > { %p1563_p6 = por %p136_p3, %p52_p0  ;;  %p143_p7 = scmp.lt.s32.totalorder %s1485_s17, 3 }
   0xe   : > { %s1827_s22 = scalar_select %p1558_p4, 1, 0 }
   0xf   : > { %s1828_s23 = scalar_select %p1563_p6, 1, 0 }
  0x10   : > { %p1568_p8 = pnand %p950_p5, %p143_p7  ;;  %s1487_s25 = smov [#allocation5]  }
  0x11   : > { %s157_s26 = sshll.u32 %s1487_s25, 4  ;;  %s32_s28 = sadd.s32 1, %s1481_s16  ;;  %s158_s26 = int_to_ptr.vmem [resolvable:$true] %s157_s26 }
  0x12   : > { %s1829_s24 = scalar_select %p1568_p8, 1, 0 }
  0x13   : > { %p1248_p9 = pneg %p1568_p8  ;;  %s1341_s4 = scalar_lea.hbm %s1818_s1, 1024 }
  0x14   : > { %p1342_p12 = scmp.ne.s32.totalorder %s1818_s1, %s1341_s4  ;;  %p1348_p5 = scmp.lt.u32.totalorder %s1341_s4, %s1818_s1 }
  0x15   : > { %p1577_p11 = pnand %p1248_p9, %p1548_p1 }
  0x17   : > { %p1343_p13 = pneg %p1577_p11 }
  0x19   : > { %p1344_p0 = pnand %p1343_p13, %p1342_p12 }
  0x1b   : > { %p1345_p3 = pneg %p1344_p0 }
  0x1d   : > { %p1350_p7 = pnand %p1348_p5, %p1345_p3 }
  0x1f   : > { %1353 = shalt.err (!%p1350_p7)
}
  0x20   : > { %s1354_s9 = scalar_lea.vmem %s158_s26, 1024  ;;  %p1362_p1 = scmp.lt.s32.totalorder %s158_s26, %s158_s26 }
  0x21   : > { %p1355_p9 = scmp.ne.s32.totalorder %s158_s26, %s1354_s9  ;;  %p1363_p4 = scmp.lt.s32.totalorder %s1354_s9, %s1354_s9 }
  0x23   : > { %p1357_p10 = pnand %p1355_p9, %p1343_p13  ;;  %p1364_p8 = por %p1363_p4, %p1362_p1 }
  0x25   : > { %p1358_p6 = pneg %p1357_p10 }
  0x27   : > { %p1365_p2 = pnand %p1364_p8, %p1358_p6 }
  0x29   : > { %1368 = shalt.err (!%p1365_p2)
}
  0x2a   : > { %s1488_s10 = smov 64   ;;  %s1489_s11 = smov 4  }
  0x2b   : > { %1251 = dma.hbm_to_vmem [thread:$0]  (!%p1577_p11), %s1818_s1, 1024, %s158_s26, [#allocation6], %s1488_s10, %s1488_s10, %s1489_s11  }
  0x2c   : > { %p34_p1 = scmp.ge.s32.totalorder %s32_s28, 2  ;;  %s39_s25 = sadd.s32 1, %s1473_s14 }
  0x2d   : > { %p46_p2 = scmp.ne.s32.totalorder %s1473_s14, %s1469_s13  ;;  %p47_p4 = scmp.eq.s32.totalorder %s1485_s17, 0 }
  0x2e   : > { %s1846_s28 = smov (%p34_p1, %s32_s28), 0  ;;  %p1832_p8 = scmp.ne.s32.totalorder %s1826_s21, 0 }
  0x2f   : > { %p1607_p6 = por %p47_p4, %p46_p2  ;;  %s36_s30 = ssub.s32 %s1481_s16, %s1846_s28 }
  0x30   : > { %p1613_p10 = por %p1832_p8, %p46_p2  ;;  %p1261_p12 = scmp.lt.s32.totalorder %s1485_s17, 2 }
  0x31   : > { %p37_p11 = scmp.eq.s32.totalorder %s36_s30, 0  ;;  %s177_s26 = sand.u32 1, %s1473_s14  }
  0x32   : > { %s954_s4 = sshll.u32 %s177_s26, 7  ;;  %s1023_s6 = sshll.u32 %s1481_s16, 11 }
  0x33   : > { %s1622_s5 = scalar_select %p37_p11, %s1473_s14, %s39_s25  }
  0x34   : > { %s1628_s9 = scalar_lea.hbm %s1817_s0, %s1023_s6  ;;  %s181_s21 = scalar_lea.vmem [#allocation2], %s954_s4 }
  0x35   : > { %s188_s18 = sshll.u32 %s181_s21, 4  ;;  %p1634_p13 = pnand %p1261_p12, %p1607_p6  ;;  %s1630_s18 = int_to_ptr.vmem [resolvable:$true] %s188_s18 }
  0x36   : > { %s1638_s25 = scalar_lea.sflag [#allocation3], %s177_s26  ;;  %s1369_s30 = scalar_lea.hbm %s1628_s9, 2048 }
  0x37   : > { %p1370_p0 = scmp.ne.s32.totalorder %s1628_s9, %s1369_s30  ;;  %p1371_p3 = pneg %p1634_p13 }
  0x38   : > { %s1374_s29 = scalar_lea.hbm %s1817_s0, 4096  ;;  %p1375_p9 = scmp.lt.u32.totalorder %s1628_s9, %s1817_s0 }
  0x39   : > { %p1372_p5 = pnand %p1371_p3, %p1370_p0  ;;  %p1376_p1 = scmp.lt.u32.totalorder %s1374_s29, %s1369_s30 }
  0x3a   : > { %p1378_p4 = scmp.lt.u32.totalorder %s1369_s30, %s1628_s9 }
  0x3b   : > { %p1373_p7 = pneg %p1372_p5  ;;  %p1377_p2 = por %p1376_p1, %p1375_p9 }
  0x3d   : > { %p1379_p6 = por %p1378_p4, %p1377_p2 }
  0x3f   : > { %p1380_p8 = pnand %p1379_p6, %p1373_p7 }
  0x41   : > { %1383 = shalt.err (!%p1380_p8)
}
  0x42   : > { %s1384_s26 = scalar_lea.vmem %s1630_s18, 2048  ;;  %s1490_s21 = smov [#allocation2]  }
  0x43   : > { %p1385_p12 = scmp.ne.s32.totalorder %s1630_s18, %s1384_s26  ;;  %s1389_s4 = sshll.u32 %s1490_s21, 4  ;;  %s1390_s4 = int_to_ptr.vmem [resolvable:$false] %s1389_s4 }
  0x44   : > { %s1391_s6 = scalar_lea.vmem %s1390_s4, 4096  ;;  %p1392_p5 = scmp.lt.s32.totalorder %s1630_s18, %s1390_s4 }
  0x45   : > { %p1387_p11 = pnand %p1385_p12, %p1371_p3  ;;  %p1393_p9 = scmp.lt.s32.totalorder %s1391_s6, %s1384_s26 }
  0x47   : > { %p1388_p0 = pneg %p1387_p11  ;;  %p1394_p1 = por %p1393_p9, %p1392_p5 }
  0x49   : > { %p1395_p2 = pnand %p1394_p1, %p1388_p0 }
  0x4b   : > { %1398 = shalt.err (!%p1395_p2)
}
  0x4c   : > { %1255 = dma.hbm_to_vmem [thread:$0]  (!%p1634_p13), %s1628_s9, 2048, %s1630_s18, %s1638_s25, %s1488_s10, %s1488_s10, %s1489_s11  }
  0x4d   : > { %p1835_p3 = scmp.ne.s32.totalorder %s1829_s24, 0 }
  0x4e   : > { %s1672_s30 = sand.u32 (!%p1835_p3), 1, %s1469_s13   ;;  %p1836_p7 = scmp.ne.s32.totalorder (!%p1835_p3), %s1827_s22, 0 }
  0x4f   : > { %200 = sbr.rel (%p1835_p3) target bundleno = 385 (0x181), region = 32  ;;  %s958_s29 = sshll.u32 (!%p1835_p3), %s1672_s30, 7 }
  0x50   : > { %s203_s7 = scalar_lea.sflag (!%p1835_p3), [#allocation3], %s1672_s30  ;;  %s1678_s19 = scalar_lea.vmem (!%p1835_p3), [#allocation2], %s958_s29 }
  0x56   : > { %1452 = dma.done.wait (%p1836_p7), %s203_s7, 2048  }
  0x57   : > { %1454 = vsyncadd (%p1836_p7), %s203_s7, 4294965248  ;;  %p1837_p13 = scmp.ne.s32.totalorder %s1825_s20, 0 }
  0x59   : > { %1456 = dma.done.wait (%p1837_p13), [#allocation6], 1024  }
  0x5a   : > { %1458 = vsyncadd (%p1837_p13), [#allocation6], 4294966272  ;;  %v1317_v0 = vld [vmem:[#allocation5] sm:$0xff]   ;;  %v1318_v1 = vld [vmem:[#allocation5 + $0x8] sm:$0xff]   ;;  %s1723_s24 = scalar_lea.vmem [#allocation7], %s958_s29  ;;  %s1056_s10 = sshll.u32 %s1477_s15, 11 }
  0x5b   : > { %1176 = vmatprep.subr.bf16.mxu0 %v1317_v0  ;;  %1224 = vmatprep.subr.bf16.mxu1 %v1317_v0  ;;  %v1319_v2 = vld [vmem:[#allocation5 + $0x10] sm:$0xff]   ;;  %v1320_v3 = vld [vmem:[#allocation5 + $0x18] sm:$0xff]   ;;  %v1325_v4 = vld [vmem:[%s1678_s19] sm:$0xff]   ;;  %s841_s11 = sshll.u32 %s1723_s24, 4  ;;  %s1762_s15 = scalar_lea.hbm %s1820_s3, %s1056_s10  ;;  %s1764_s11 = int_to_ptr.vmem [resolvable:$true] %s841_s11 }
  0x5c   : > { %1177 = vmatpush3.bf16.msra.mxu0 %v1317_v0  ;;  %1232 = vmatpush3.bf16.msra.mxu1 %v1317_v0  ;;  %v1326_v5 = vld [vmem:[%s1678_s19 + $0x40] sm:$0xff]   ;;  %v1322_v7 = vld [vmem:[#allocation5 + $0x28] sm:$0xff]   ;;  %v1323_v8 = vld [vmem:[#allocation5 + $0x30] sm:$0xff]   ;;  %s827_s25 = scalar_lea.sflag [#allocation4], %s1672_s30  ;;  %s1399_s8 = scalar_lea.vmem %s1764_s11, 2048 }
  0x5d   : > { %1178 = vmatprep.subr.bf16.mxu0 %v1318_v1  ;;  %1225 = vmatprep.subr.bf16.mxu1 %v1318_v1  ;;  %v1321_v6 = vld [vmem:[#allocation5 + $0x20] sm:$0xff]   ;;  %v1324_v9 = vld [vmem:[#allocation5 + $0x38] sm:$0xff]   ;;  %v1327_v10 = vld [vmem:[%s1678_s19 + $0x8] sm:$0xff]   ;;  %p1400_p4 = scmp.ne.s32.totalorder %s1764_s11, %s1399_s8  ;;  %s1491_s26 = smov [#allocation7]  }
  0x5e   : > { %1192 = vmatprep.mubr.bf16.mxu0 %v1325_v4  ;;  %1208 = vmatprep.mubr.bf16.mxu1 %v1326_v5  ;;  %v1328_v11 = vld [vmem:[%s1678_s19 + $0x48] sm:$0xff]   ;;  %v1329_v12 = vld [vmem:[%s1678_s19 + $0x10] sm:$0xff]   ;;  %v1331_v14 = vld [vmem:[%s1678_s19 + $0x18] sm:$0xff]   ;;  %s1403_s21 = sshll.u32 %s1491_s26, 4  ;;  %s1404_s21 = int_to_ptr.vmem [resolvable:$false] %s1403_s21 }
  0x5f   : > { %v1330_v13 = vld [vmem:[%s1678_s19 + $0x50] sm:$0xff]   ;;  %v1332_v15 = vld [vmem:[%s1678_s19 + $0x58] sm:$0xff]   ;;  %v1333_v16 = vld [vmem:[%s1678_s19 + $0x20] sm:$0xff]   ;;  %p1401_p6 = pnand %p1400_p4, %p1613_p10  ;;  %s1405_s4 = scalar_lea.vmem %s1404_s21, 4096 }
  0x60   : > { %1179 = vmatpush3.bf16.msra.mxu0 %v1318_v1  ;;  %1233 = vmatpush3.bf16.msra.mxu1 %v1318_v1  ;;  %v1334_v17 = vld [vmem:[%s1678_s19 + $0x60] sm:$0xff]   ;;  %v1335_v18 = vld [vmem:[%s1678_s19 + $0x28] sm:$0xff]   ;;  %v1337_v20 = vld [vmem:[%s1678_s19 + $0x30] sm:$0xff]   ;;  %p1406_p12 = scmp.lt.s32.totalorder %s1764_s11, %s1404_s21  ;;  %p1407_p11 = scmp.lt.s32.totalorder %s1405_s4, %s1399_s8 }
  0x61   : > { %1180 = vmatprep.subr.bf16.mxu0 %v1319_v2  ;;  %1226 = vmatprep.subr.bf16.mxu1 %v1319_v2  ;;  %v1336_v19 = vld [vmem:[%s1678_s19 + $0x68] sm:$0xff]   ;;  %v1338_v21 = vld [vmem:[%s1678_s19 + $0x70] sm:$0xff]   ;;  %v1339_v22 = vld [vmem:[%s1678_s19 + $0x38] sm:$0xff]   ;;  %p1402_p8 = pneg %p1401_p6 }
  0x62   : > { %v1340_v23 = vld [vmem:[%s1678_s19 + $0x78] sm:$0xff]   ;;  %v1707_v24 = vld [vmem:[%s1819_s2] ss:$0 sm:$0xff]  ;;  %p1408_p0 = por %p1407_p11, %p1406_p12 }
  0x64   : > { %1181 = vmatpush3.bf16.msra.mxu0 %v1319_v2  ;;  %1234 = vmatpush3.bf16.msra.mxu1 %v1319_v2  ;;  %p1409_p5 = pnand %p1408_p0, %p1402_p8 }
  0x65   : > { %1182 = vmatprep.subr.bf16.mxu0 %v1320_v3  ;;  %1227 = vmatprep.subr.bf16.mxu1 %v1320_v3 }
  0x68   : > { %1183 = vmatpush3.bf16.msra.mxu0 %v1320_v3  ;;  %1235 = vmatpush3.bf16.msra.mxu1 %v1320_v3 }
  0x69   : > { %1184 = vmatprep.subr.bf16.mxu0 %v1321_v6  ;;  %1228 = vmatprep.subr.bf16.mxu1 %v1321_v6 }
  0x6c   : > { %1185 = vmatpush3.bf16.msra.mxu0 %v1321_v6  ;;  %1236 = vmatpush3.bf16.msra.mxu1 %v1321_v6 }
  0x6d   : > { %1186 = vmatprep.subr.bf16.mxu0 %v1322_v7  ;;  %1229 = vmatprep.subr.bf16.mxu1 %v1322_v7 }
  0x70   : > { %1187 = vmatpush3.bf16.msra.mxu0 %v1322_v7  ;;  %1237 = vmatpush3.bf16.msra.mxu1 %v1322_v7 }
  0x71   : > { %1188 = vmatprep.subr.bf16.mxu0 %v1323_v8  ;;  %1230 = vmatprep.subr.bf16.mxu1 %v1323_v8 }
  0x74   : > { %1189 = vmatpush3.bf16.msra.mxu0 %v1323_v8  ;;  %1238 = vmatpush3.bf16.msra.mxu1 %v1323_v8 }
  0x75   : > { %1190 = vmatprep.subr.bf16.mxu0 %v1324_v9  ;;  %1231 = vmatprep.subr.bf16.mxu1 %v1324_v9 }
  0x78   : > { %1191 = vmatpush3.bf16.msra.mxu0 %v1324_v9  ;;  %1239 = vmatpush3.bf16.msra.mxu1 %v1324_v9 }
  0x7b   : > { %1193 = vmatmul.mubr.bf16.vlgmr.msra.gmra.mrb[0].mxu0 %v1327_v10  ;;  %1209 = vmatmul.mubr.bf16.vlgmr.msra.gmra.mrb[0].mxu1 %v1328_v11 }
  0x7c   : > { %1196 = vmatprep.mubr.bf16.mxu0 %v1329_v12  ;;  %1212 = vmatprep.mubr.bf16.mxu1 %v1330_v13 }
  0x83   : > { %1197 = vmatmul.mubr.bf16.gmra.mrb[4].mxu0 %v1331_v14  ;;  %1213 = vmatmul.mubr.bf16.gmra.mrb[4].mxu1 %v1332_v15 }
  0x84   : > { %1200 = vmatprep.mubr.bf16.mxu0 %v1333_v16  ;;  %1216 = vmatprep.mubr.bf16.mxu1 %v1334_v17 }
  0x8b   : > { %1201 = vmatmul.mubr.bf16.gmra.mrb[8].mxu0 %v1335_v18  ;;  %1217 = vmatmul.mubr.bf16.gmra.mrb[8].mxu1 %v1336_v19 }
  0x8c   : > { %1204 = vmatprep.mubr.bf16.mxu0 %v1337_v20  ;;  %1220 = vmatprep.mubr.bf16.mxu1 %v1338_v21 }
  0x93   : > { %1205 = vmatmul.mubr.bf16.gmra.mrb[12].mxu0 %v1339_v22  ;;  %1221 = vmatmul.mubr.bf16.gmra.mrb[12].mxu1 %v1340_v23 }
 0x14e   : > { %v1194_v25 = vpop.f32.mrb[0].mxu0  ;;  %v1210_v26 = vpop.f32.mrb[0].mxu1 }
 0x14f   : > { %v484_v27 = vadd.f32 %v1194_v25, %v1707_v24  ;;  %v548_v28 = vadd.f32 %v1210_v26, %v1707_v24  ;;  %v475_v29 = vpop.f32.mrb[1].mxu0  ;;  %v539_v30 = vpop.f32.mrb[1].mxu1 }
 0x150   : > { %v476_v31 = vadd.f32 %v1707_v24, %v475_v29  ;;  %v540_v32 = vadd.f32 %v1707_v24, %v539_v30  ;;  %v1195_v33 = vpop.f32.mrb[2].mxu0  ;;  %v1211_v34 = vpop.f32.mrb[2].mxu1 }
 0x151   : > { %v604_v35 = vmax.f32 %v484_v27, 0.0  ;;  %v620_v36 = vmax.f32 %v548_v28, 0.0  ;;  %v487_v37 = vadd.f32 %v1195_v33, %v1707_v24  ;;  %v551_v38 = vadd.f32 %v1211_v34, %v1707_v24  ;;  %v478_v39 = vpop.f32.mrb[3].mxu0  ;;  %v542_v40 = vpop.f32.mrb[3].mxu1 }
 0x152   : > { %v602_v41 = vmax.f32 %v476_v31, 0.0  ;;  %v618_v42 = vmax.f32 %v540_v32, 0.0  ;;  %v479_v43 = vadd.f32 %v1707_v24, %v478_v39  ;;  %v543_v44 = vadd.f32 %v1707_v24, %v542_v40 }
 0x153   : > { %v605_v45 = vmax.f32 %v487_v37, 0.0  ;;  %v621_v46 = vmax.f32 %v551_v38, 0.0  ;;  %v636_v49 = vmin.f32 %v604_v35, 6.0  ;;  %v652_v50 = vmin.f32 %v620_v36, 6.0 }
 0x154   : > { %v603_v47 = vmax.f32 %v479_v43, 0.0  ;;  %v619_v48 = vmax.f32 %v543_v44, 0.0  ;;  %v634_v53 = vmin.f32 %v602_v41, 6.0  ;;  %v650_v54 = vmin.f32 %v618_v42, 6.0 }
 0x155   : > { %v637_v51 = vmin.f32 %v605_v45, 6.0  ;;  %v653_v52 = vmin.f32 %v621_v46, 6.0 }
 0x156   : > { %v635_v55 = vmin.f32 %v603_v47, 6.0  ;;  %v651_v56 = vmin.f32 %v619_v48, 6.0  ;;  %v1198_v57 = vpop.f32.mrb[4].mxu0  ;;  %v1214_v58 = vpop.f32.mrb[4].mxu1 }
 0x157   : > { %v1065_v59 = vpack.c.bf16 %v637_v51, %v636_v49  ;;  %v1105_v60 = vpack.c.bf16 %v653_v52, %v652_v50  ;;  %v500_v61 = vadd.f32 %v1198_v57, %v1707_v24  ;;  %v564_v62 = vadd.f32 %v1214_v58, %v1707_v24  ;;  %v491_v63 = vpop.f32.mrb[5].mxu0  ;;  %v555_v0 = vpop.f32.mrb[5].mxu1 }
 0x158   : > { %v1060_v1 = vpack.c.bf16 %v635_v55, %v634_v53  ;;  %v1100_v2 = vpack.c.bf16 %v651_v56, %v650_v54  ;;  %v492_v3 = vadd.f32 %v1707_v24, %v491_v63  ;;  %v556_v4 = vadd.f32 %v1707_v24, %v555_v0  ;;  %v1199_v5 = vpop.f32.mrb[6].mxu0  ;;  %v1215_v6 = vpop.f32.mrb[6].mxu1 }
 0x159   : > { %1137 = vst [vmem:[%s1723_s24 + $0x8] sm:$0xff] %v1065_v59   ;;  %1145 = vst [vmem:[%s1723_s24 + $0x48] sm:$0xff] %v1105_v60   ;;  %v608_v7 = vmax.f32 %v500_v61, 0.0  ;;  %v624_v8 = vmax.f32 %v564_v62, 0.0  ;;  %v503_v9 = vadd.f32 %v1199_v5, %v1707_v24  ;;  %v567_v10 = vadd.f32 %v1215_v6, %v1707_v24  ;;  %v494_v11 = vpop.f32.mrb[7].mxu0  ;;  %v558_v12 = vpop.f32.mrb[7].mxu1 }
 0x15a   : > { %1061 = vst [vmem:[%s1723_s24] sm:$0xff] %v1060_v1   ;;  %1144 = vst [vmem:[%s1723_s24 + $0x40] sm:$0xff] %v1100_v2   ;;  %v606_v13 = vmax.f32 %v492_v3, 0.0  ;;  %v622_v14 = vmax.f32 %v556_v4, 0.0  ;;  %v495_v15 = vadd.f32 %v1707_v24, %v494_v11  ;;  %v559_v16 = vadd.f32 %v1707_v24, %v558_v12 }
 0x15b   : > { %v609_v17 = vmax.f32 %v503_v9, 0.0  ;;  %v625_v18 = vmax.f32 %v567_v10, 0.0  ;;  %v640_v21 = vmin.f32 %v608_v7, 6.0  ;;  %v656_v22 = vmin.f32 %v624_v8, 6.0 }
 0x15c   : > { %v607_v19 = vmax.f32 %v495_v15, 0.0  ;;  %v623_v20 = vmax.f32 %v559_v16, 0.0  ;;  %v638_v26 = vmin.f32 %v606_v13, 6.0  ;;  %v654_v27 = vmin.f32 %v622_v14, 6.0 }
 0x15d   : > { %v641_v23 = vmin.f32 %v609_v17, 6.0  ;;  %v657_v25 = vmin.f32 %v625_v18, 6.0 }
 0x15e   : > { %v639_v28 = vmin.f32 %v607_v19, 6.0  ;;  %v655_v29 = vmin.f32 %v623_v20, 6.0  ;;  %v1202_v30 = vpop.f32.mrb[8].mxu0  ;;  %v1218_v31 = vpop.f32.mrb[8].mxu1 }
 0x15f   : > { %v1075_v32 = vpack.c.bf16 %v641_v23, %v640_v21  ;;  %v1115_v33 = vpack.c.bf16 %v657_v25, %v656_v22  ;;  %v516_v34 = vadd.f32 %v1202_v30, %v1707_v24  ;;  %v580_v35 = vadd.f32 %v1218_v31, %v1707_v24  ;;  %v507_v36 = vpop.f32.mrb[9].mxu0  ;;  %v571_v37 = vpop.f32.mrb[9].mxu1 }
 0x160   : > { %v1070_v38 = vpack.c.bf16 %v639_v28, %v638_v26  ;;  %v1110_v39 = vpack.c.bf16 %v655_v29, %v654_v27  ;;  %v508_v40 = vadd.f32 %v1707_v24, %v507_v36  ;;  %v572_v41 = vadd.f32 %v1707_v24, %v571_v37  ;;  %v1203_v42 = vpop.f32.mrb[10].mxu0  ;;  %v1219_v43 = vpop.f32.mrb[10].mxu1 }
 0x161   : > { %1139 = vst [vmem:[%s1723_s24 + $0x18] sm:$0xff] %v1075_v32   ;;  %1147 = vst [vmem:[%s1723_s24 + $0x58] sm:$0xff] %v1115_v33   ;;  %v612_v44 = vmax.f32 %v516_v34, 0.0  ;;  %v628_v45 = vmax.f32 %v580_v35, 0.0  ;;  %v519_v46 = vadd.f32 %v1203_v42, %v1707_v24  ;;  %v583_v47 = vadd.f32 %v1219_v43, %v1707_v24  ;;  %v510_v48 = vpop.f32.mrb[11].mxu0  ;;  %v574_v49 = vpop.f32.mrb[11].mxu1 }
 0x162   : > { %1138 = vst [vmem:[%s1723_s24 + $0x10] sm:$0xff] %v1070_v38   ;;  %1146 = vst [vmem:[%s1723_s24 + $0x50] sm:$0xff] %v1110_v39   ;;  %v610_v50 = vmax.f32 %v508_v40, 0.0  ;;  %v626_v51 = vmax.f32 %v572_v41, 0.0  ;;  %v511_v52 = vadd.f32 %v1707_v24, %v510_v48  ;;  %v575_v53 = vadd.f32 %v1707_v24, %v574_v49 }
 0x163   : > { %v613_v54 = vmax.f32 %v519_v46, 0.0  ;;  %v629_v55 = vmax.f32 %v583_v47, 0.0  ;;  %v644_v58 = vmin.f32 %v612_v44, 6.0  ;;  %v660_v59 = vmin.f32 %v628_v45, 6.0 }
 0x164   : > { %v611_v56 = vmax.f32 %v511_v52, 0.0  ;;  %v627_v57 = vmax.f32 %v575_v53, 0.0  ;;  %v642_v62 = vmin.f32 %v610_v50, 6.0  ;;  %v658_v63 = vmin.f32 %v626_v51, 6.0 }
 0x165   : > { %v645_v60 = vmin.f32 %v613_v54, 6.0  ;;  %v661_v61 = vmin.f32 %v629_v55, 6.0 }
 0x166   : > { %v643_v0 = vmin.f32 %v611_v56, 6.0  ;;  %v659_v1 = vmin.f32 %v627_v57, 6.0  ;;  %v1206_v2 = vpop.f32.mrb[12].mxu0  ;;  %v1222_v3 = vpop.f32.mrb[12].mxu1 }
 0x167   : > { %v1085_v4 = vpack.c.bf16 %v645_v60, %v644_v58  ;;  %v1125_v5 = vpack.c.bf16 %v661_v61, %v660_v59  ;;  %v532_v6 = vadd.f32 %v1206_v2, %v1707_v24  ;;  %v596_v7 = vadd.f32 %v1222_v3, %v1707_v24  ;;  %v523_v8 = vpop.f32.mrb[13].mxu0  ;;  %v587_v9 = vpop.f32.mrb[13].mxu1 }
 0x168   : > { %v1080_v10 = vpack.c.bf16 %v643_v0, %v642_v62  ;;  %v1120_v11 = vpack.c.bf16 %v659_v1, %v658_v63  ;;  %v524_v12 = vadd.f32 %v1707_v24, %v523_v8  ;;  %v588_v13 = vadd.f32 %v1707_v24, %v587_v9  ;;  %v1207_v14 = vpop.f32.mrb[14].mxu0  ;;  %v1223_v15 = vpop.f32.mrb[14].mxu1 }
 0x169   : > { %1141 = vst [vmem:[%s1723_s24 + $0x28] sm:$0xff] %v1085_v4   ;;  %1149 = vst [vmem:[%s1723_s24 + $0x68] sm:$0xff] %v1125_v5   ;;  %v616_v16 = vmax.f32 %v532_v6, 0.0  ;;  %v632_v17 = vmax.f32 %v596_v7, 0.0  ;;  %v535_v18 = vadd.f32 %v1207_v14, %v1707_v24  ;;  %v599_v19 = vadd.f32 %v1223_v15, %v1707_v24  ;;  %v526_v20 = vpop.f32.mrb[15].mxu0  ;;  %v590_v21 = vpop.f32.mrb[15].mxu1 }
 0x16a   : > { %1140 = vst [vmem:[%s1723_s24 + $0x20] sm:$0xff] %v1080_v10   ;;  %1148 = vst [vmem:[%s1723_s24 + $0x60] sm:$0xff] %v1120_v11   ;;  %v614_v22 = vmax.f32 %v524_v12, 0.0  ;;  %v630_v23 = vmax.f32 %v588_v13, 0.0  ;;  %v527_v25 = vadd.f32 %v1707_v24, %v526_v20  ;;  %v591_v26 = vadd.f32 %v1707_v24, %v590_v21 }
 0x16b   : > { %v617_v27 = vmax.f32 %v535_v18, 0.0  ;;  %v633_v28 = vmax.f32 %v599_v19, 0.0  ;;  %v648_v31 = vmin.f32 %v616_v16, 6.0  ;;  %v664_v32 = vmin.f32 %v632_v17, 6.0 }
 0x16c   : > { %v615_v29 = vmax.f32 %v527_v25, 0.0  ;;  %v631_v30 = vmax.f32 %v591_v26, 0.0  ;;  %v646_v35 = vmin.f32 %v614_v22, 6.0  ;;  %v662_v36 = vmin.f32 %v630_v23, 6.0 }
 0x16d   : > { %v649_v33 = vmin.f32 %v617_v27, 6.0  ;;  %v665_v34 = vmin.f32 %v633_v28, 6.0 }
 0x16e   : > { %v647_v37 = vmin.f32 %v615_v29, 6.0  ;;  %v663_v24 = vmin.f32 %v631_v30, 6.0 }
 0x16f   : > { %v1095_v38 = vpack.c.bf16 %v649_v33, %v648_v31  ;;  %v1135_v39 = vpack.c.bf16 %v665_v34, %v664_v32 }
 0x170   : > { %v1090_v40 = vpack.c.bf16 %v647_v37, %v646_v35  ;;  %v1130_v41 = vpack.c.bf16 %v663_v24, %v662_v36 }
 0x171   : > { %1143 = vst [vmem:[%s1723_s24 + $0x38] sm:$0xff] %v1095_v38   ;;  %1151 = vst [vmem:[%s1723_s24 + $0x78] sm:$0xff] %v1135_v39  }
 0x172   : > { %1142 = vst [vmem:[%s1723_s24 + $0x30] sm:$0xff] %v1090_v40   ;;  %1150 = vst [vmem:[%s1723_s24 + $0x70] sm:$0xff] %v1130_v41  }
 0x173   : > { %1412 = shalt.err (!%p1409_p5)
}
 0x174   : > { %s1413_s6 = scalar_lea.hbm %s1762_s15, 2048  ;;  %s1417_s19 = scalar_lea.hbm %s1820_s3, 4096 }
 0x175   : > { %p1414_p9 = scmp.ne.s32.totalorder %s1762_s15, %s1413_s6  ;;  %p1418_p3 = scmp.lt.u32.totalorder %s1762_s15, %s1820_s3 }
 0x176   : > { %p1419_p7 = scmp.lt.u32.totalorder %s1417_s19, %s1413_s6  ;;  %p1421_p4 = scmp.lt.u32.totalorder %s1413_s6, %s1762_s15 }
 0x177   : > { %p1415_p1 = pnand %p1414_p9, %p1613_p10 }
 0x178   : > { %p1420_p13 = por %p1419_p7, %p1418_p3 }
 0x179   : > { %p1416_p2 = pneg %p1415_p1 }
 0x17a   : > { %p1422_p6 = por %p1421_p4, %p1420_p13 }
 0x17c   : > { %p1423_p8 = pnand %p1422_p6, %p1416_p2 }
 0x17e   : > { %1426 = shalt.err (!%p1423_p8)
}
 0x17f   : > { %s1492_s24 = smov 64   ;;  %s1493_s10 = smov 4  }
 0x180   : > { %1246 = dma.vmem_to_hbm [thread:$0]  (%p1613_p10), %s1764_s11, 2048, %s1762_s15, %s827_s25, %s1492_s24, %s1492_s24, %s1493_s10  }
 0x181 PF: > { %s856_s9 = sand.u32 1, %s1465_s12   ;;  %p1838_p12 = scmp.ne.s32.totalorder %s1828_s23, 0 }
 0x182   : > { %p1839_p11 = scmp.ge.s32.totalorder %s1485_s17, 2  ;;  %s857_s18 = scalar_lea.sflag [#allocation4], %s856_s9 }
 0x184   : > { %p1257_p0 = pnand %p1839_p11, %p1838_p12 }
 0x186   : > { %1460 = dma.done.wait (!%p1257_p0), %s857_s18, 2048  }
 0x187   : > { %1462 = vsyncadd (!%p1257_p0), %s857_s18, 4294965248  ;;  %s20_s17 = sadd.s32 1, %s1485_s17   ;;  %s1840_s12 = smov %s1469_s13 }
 0x188   : > { %p17_p5 = scmp.ge.s32.totalorder %s20_s17, 4   ;;  %s1841_s13 = smov %s1473_s14 }
 0x189   : > { %s1842_s14 = smov %s1622_s5  ;;  %s1843_s15 = smov %s1481_s16 }
 0x18a   : > { %s1844_s16 = smov %s1846_s28  ;;  %19 = sbr.rel (!%p17_p5) target bundleno = 7 (0x7), region = 85 }
 0x191   :  { %862 = vsyncpa [#allocation3], 1 }
 0x192   :  { %864 = vsyncpa [#allocation3 + $0x1], 1 }
 0x193   :  { %865 = vsyncpa [#allocation6], 1 }
 0x194   :  { %866 = vsyncpa [#allocation4], 1 }
 0x195   :  { %868 = vsyncpa [#allocation4 + $0x1], 1 }

</bundles_post_ra>
